<compile_context>
chip_gen: v7x
topology: tpu7x:2x2x1
jax: 0.10.0
libtpu: 0.0.40
codegen_flags: <defaults>
</compile_context>

<pallas_src>
import functools

import jax
import jax.numpy as jnp
import numpy as np
from jax import lax
from jax.experimental import pallas as pl
from jax.experimental.pallas import tpu as pltpu


def _pos_embedding_kernel(ids_ref, wemb_ref, pemb_ref, out_ref, *, batch, seq):
    # ids_ref : VMEM (B*S, 1) int32   flattened token ids (column vector)
    # wemb_ref: VMEM (V, D)           word-embedding table (fully VMEM-resident)
    # pemb_ref: VMEM (S, D)           first S rows of the positional table
    # out_ref : VMEM (B*S, D)         flattened output slab (lane-dense store)
    BS, D = out_ref.shape
    V = wemb_ref.shape[0]

    ids = ids_ref[...]                                         # (BS, 1) int32

    # One-hot gather on the MXU: (BS, V) @ (V, D) -> (BS, D).
    # Products are exactly 0*x or 1*x, so the result matches a row gather bit-exactly.
    vocab_iota = lax.broadcasted_iota(jnp.int32, (BS, V), 1)   # (BS, V)
    one_hot = (vocab_iota == ids).astype(jnp.float32)          # (BS, V) 0/1
    gathered = jnp.dot(one_hot, wemb_ref[...].astype(jnp.float32),
                       preferred_element_type=jnp.float32)     # (BS, D)

    # Position slab loaded once, tiled across the batch (row r gets pos row r % S).
    pos_slab = pemb_ref[0:seq, :].astype(jnp.float32)          # (S, D) static slice
    pos = jnp.concatenate([pos_slab] * batch, axis=0)          # (BS, D)

    # ONE tile-wide add + ONE unmasked dense store.
    out_ref[...] = (gathered + pos).astype(out_ref.dtype)


def position_embedding(ids, word_emb, pos_emb):
    """ids: (B, S) int32; word_emb: (V, D); pos_emb: (P>=S, D) -> (B, S, D)."""
    B, S = ids.shape
    V, D = word_emb.shape
    P, _ = pos_emb.shape
    assert S <= P, "sequence length exceeds positional table (100)"
    BS = B * S

    # DMA only the first S rows of the positional table when the block obeys the
    # (8,128) tiling rule; otherwise fall back to the full-table block (still correct).
    pos_rows = S if (S % 8 == 0 and D % 128 == 0) else P

    ids_flat = ids.reshape(BS, 1).astype(jnp.int32)

    kernel = functools.partial(_pos_embedding_kernel, batch=B, seq=S)

    # TODO(synk): for production vocab sizes (table > VMEM, esp. v7x 64 MiB/TC),
    # keep word_emb in HBM (memory_space=pl.ANY) and gather only the S needed rows
    # via scalar-prefetched ids + manual DMA instead of a fully resident block.
    out_flat = pl.pallas_call(
        kernel,
        out_shape=jax.ShapeDtypeStruct((BS, D), word_emb.dtype),
        grid=(1,),  # single step: whole (B*S, D) output emitted at once
        in_specs=[
            pl.BlockSpec((BS, 1), lambda i: (0, 0)),        # flattened ids
            pl.BlockSpec((V, D), lambda i: (0, 0)),         # full word table
            pl.BlockSpec((pos_rows, D), lambda i: (0, 0)),  # trimmed pos slab
        ],
        out_specs=pl.BlockSpec((BS, D), lambda i: (0, 0)),
        compiler_params=pltpu.CompilerParams(
            dimension_semantics=("arbitrary",)),
    )(ids_flat, word_emb, pos_emb)

    return out_flat.reshape(B, S, D)


if __name__ == "__main__":
    key = jax.random.PRNGKey(0)
    k_w, k_p, k_ids = jax.random.split(key, 3)

    # module hyperparameters (deterministic synthetic init, N(0,1) like nn.Embedding)
    num_embeddings = 32      # vocab size
    embedding_dims = 128     # hidden dim (lane-friendly)
    max_positions = 100      # hard-coded in the PyTorch module
    B, S = 2, 8              # batch, seq

    word_emb = jax.random.normal(k_w, (num_embeddings, embedding_dims), jnp.float32)
    pos_emb = jax.random.normal(k_p, (max_positions, embedding_dims), jnp.float32)
    ids = jax.random.randint(k_ids, (B, S), 0, num_embeddings, dtype=jnp.int32)

    out = position_embedding(ids, word_emb, pos_emb)
    out = jax.block_until_ready(out)

    # pure-JAX reference
    ref = word_emb[ids] + pos_emb[jnp.arange(S)][None, :, :]
    assert out.shape == (B, S, embedding_dims)
    np.testing.assert_allclose(np.asarray(out), np.asarray(ref), rtol=1e-6, atol=1e-6)
    print("KERNEL_OK")
</pallas_src>

<mosaic_0001>
module attributes {stable_mosaic.version = 11 : i64} {
  func.func @_pos_embedding_kernel(%arg0: i32, %arg1: memref<16x1xi32, #tpu.memory_space<vmem>>, %arg2: memref<32x128xf32, #tpu.memory_space<vmem>>, %arg3: memref<8x128xf32, #tpu.memory_space<vmem>>, %arg4: memref<16x128xf32, #tpu.memory_space<vmem>>) attributes {dimension_semantics = [#tpu.dimension_semantics<arbitrary>], iteration_bounds = array<i64: 1>, scalar_prefetch = 0 : i64, scratch_operands = 0 : i64, tpu.core_type = #tpu.core_type<tc>, window_params = [{pipeline_mode = #tpu.pipeline_mode<synchronous>, transform_indices = @transform_0, window_bounds = array<i64: 16, 1>}, {pipeline_mode = #tpu.pipeline_mode<synchronous>, transform_indices = @transform_1, window_bounds = array<i64: 32, 128>}, {transform_indices = @transform_2, window_bounds = array<i64: 8, 128>}, {pipeline_mode = #tpu.pipeline_mode<synchronous>, transform_indices = @transform_3, window_bounds = array<i64: 16, 128>}]} {
    %c0 = arith.constant 0 : index
    %c0_0 = arith.constant 0 : index
    %0 = vector.load %arg1[%c0, %c0_0] : memref<16x1xi32, #tpu.memory_space<vmem>>, vector<16x1xi32>
    %1 = tpu.iota {dimensions = array<i32: 1>} : vector<16x32xi32>
    %2 = vector.broadcast %0 : vector<16x1xi32> to vector<16x32xi32>
    %3 = arith.cmpi eq, %1, %2 : vector<16x32xi32>
    %4 = arith.extui %3 : vector<16x32xi1> to vector<16x32xi32>
    %5 = arith.sitofp %4 : vector<16x32xi32> to vector<16x32xf32>
    %c0_1 = arith.constant 0 : index
    %c0_2 = arith.constant 0 : index
    %6 = vector.load %arg2[%c0_1, %c0_2] : memref<32x128xf32, #tpu.memory_space<vmem>>, vector<32x128xf32>
    %cst = arith.constant dense<0.000000e+00> : vector<16x128xf32>
    %7 = tpu.matmul %5, %6, %cst {dimension_numbers = #tpu.dot_dimension_numbers<[1], [0], [0], [1], [0, 0, 1, 1], [], []>} : vector<16x32xf32>, vector<32x128xf32>, vector<16x128xf32> -> vector<16x128xf32>
    %c0_3 = arith.constant 0 : index
    %c0_4 = arith.constant 0 : index
    %8 = vector.load %arg3[%c0_3, %c0_4] : memref<8x128xf32, #tpu.memory_space<vmem>>, vector<8x128xf32>
    %9 = tpu.concatenate %8, %8 in 0 : vector<8x128xf32>, vector<8x128xf32> -> vector<16x128xf32>
    %10 = arith.addf %7, %9 : vector<16x128xf32>
    %c0_5 = arith.constant 0 : index
    %c0_6 = arith.constant 0 : index
    %11 = vector.load %arg4[%c0_5, %c0_6] : memref<16x128xf32, #tpu.memory_space<vmem>>, vector<16x128xf32>
    tpu.vector_store %arg4[%c0_5, %c0_6], %10 {strides = array<i32>} : memref<16x128xf32, #tpu.memory_space<vmem>>, vector<16x128xf32>,
    return
  }
  func.func @transform_0(%arg0: i32) -> (i32, i32) {
    %c0_i32 = arith.constant 0 : i32
    %c0_i32_0 = arith.constant 0 : i32
    %c0_i32_1 = arith.constant 0 : i32
    return %c0_i32, %c0_i32_0 : i32, i32
  }
  func.func @transform_1(%arg0: i32) -> (i32, i32) {
    %c0_i32 = arith.constant 0 : i32
    %c0_i32_0 = arith.constant 0 : i32
    %c0_i32_1 = arith.constant 0 : i32
    return %c0_i32, %c0_i32_0 : i32, i32
  }
  func.func @transform_2(%arg0: i32) -> (i32, i32) {
    %c0_i32 = arith.constant 0 : i32
    %c0_i32_0 = arith.constant 0 : i32
    %c0_i32_1 = arith.constant 0 : i32
    return %c0_i32, %c0_i32_0 : i32, i32
  }
  func.func @transform_3(%arg0: i32) -> (i32, i32) {
    %c0_i32 = arith.constant 0 : i32
    %c0_i32_0 = arith.constant 0 : i32
    %c0_i32_1 = arith.constant 0 : i32
    return %c0_i32, %c0_i32_0 : i32, i32
  }
}

</mosaic_0001>

<bundles_post_ra>
// kernel: tpu_custom_call.1
= control target key start
LH: loop header
LB: loop body
LE: loop exit
PB: predicated region body
PF: predicated region fallthrough
CT: control target
= control target key end

     0   :  { %8 = vsyncpa [#allocation3], 0  ;;  %s351_s0 = inlined_call_operand.vmem [shape: s32[16,1], index: 0, kind: input, shape index: {}]   ;;  %s352_s1 = inlined_call_operand.hbm [shape: f32[32,128], index: 1, kind: input, shape index: {}]   ;;  %s353_s2 = inlined_call_operand.hbm [shape: f32[100,128], index: 2, kind: input, shape index: {}]   ;;  %s354_s3 = inlined_call_operand.hbm [shape: f32[16,128], index: 3, kind: output, shape index: {}]  }
   0x1   :  { %9 = vsyncpa [#allocation6], 0 }
   0x2   :  { %10 = vsyncpa [#allocation4], 0  ;;  %s273_s12 = smov [#allocation2]   ;;  %s201_s16 = scalar_lea.hbm %s352_s1, 512 }
   0x3   :  { %s18_s13 = sshll.u32 %s273_s12, 4  ;;  %p202_p0 = scmp.ne.s32.totalorder %s352_s1, %s201_s16  ;;  %s19_s13 = int_to_ptr.vmem [resolvable:$true] %s18_s13 }
   0x4   :  { %p205_p1 = scmp.lt.u32.totalorder %s201_s16, %s352_s1 }
   0x6   :  { %p207_p2 = pnand %p205_p1, %p202_p0 }
   0x8   :  { %210 = shalt.err (!%p207_p2)
}
   0x9   :  { %s211_s21 = scalar_lea.vmem %s19_s13, 512  ;;  %p216_p4 = scmp.lt.s32.totalorder %s19_s13, %s19_s13 }
   0xa   :  { %p212_p3 = scmp.ne.s32.totalorder %s19_s13, %s211_s21  ;;  %p217_p5 = scmp.lt.s32.totalorder %s211_s21, %s211_s21 }
   0xc   :  { %p218_p6 = por %p217_p5, %p216_p4 }
   0xe   :  { %p219_p7 = pnand %p218_p6, %p212_p3 }
  0x10   :  { %222 = shalt.err (!%p219_p7)
}
  0x11   :  { %s274_s22 = smov 128   ;;  %s275_s23 = smov 8  }
  0x12   :  { %24 = dma.hbm_to_vmem [thread:$0]  %s352_s1, 512, %s19_s13, [#allocation3], %s274_s22, %s274_s22, %s275_s23  }
  0x13   :  { %s276_s26 = smov [#allocation5]   ;;  %s223_s30 = scalar_lea.hbm %s353_s2, 128 }
  0x14   :  { %s31_s27 = sshll.u32 %s276_s26, 4  ;;  %p224_p8 = scmp.ne.s32.totalorder %s353_s2, %s223_s30  ;;  %s32_s27 = int_to_ptr.vmem [resolvable:$true] %s31_s27 }
  0x15   :  { %s225_s8 = scalar_lea.hbm %s353_s2, 1664  ;;  %p227_p10 = scmp.lt.u32.totalorder %s223_s30, %s353_s2 }
  0x16   :  { %p226_p9 = scmp.lt.u32.totalorder %s225_s8, %s223_s30 }
  0x18   :  { %p228_p11 = por %p227_p10, %p226_p9 }
  0x1a   :  { %p229_p12 = pnand %p228_p11, %p224_p8 }
  0x1c   :  { %232 = shalt.err (!%p229_p12)
}
  0x1d   :  { %s233_s1 = scalar_lea.vmem %s32_s27, 128  ;;  %p238_p0 = scmp.lt.s32.totalorder %s32_s27, %s32_s27 }
  0x1e   :  { %p234_p13 = scmp.ne.s32.totalorder %s32_s27, %s233_s1  ;;  %p239_p1 = scmp.lt.s32.totalorder %s233_s1, %s233_s1 }
  0x20   :  { %p240_p2 = por %p239_p1, %p238_p0 }
  0x22   :  { %p241_p3 = pnand %p240_p2, %p234_p13 }
  0x24   :  { %244 = shalt.err (!%p241_p3)
}
  0x25   :  { %34 = dma.hbm_to_vmem [thread:$0]  %s353_s2, 128, %s32_s27, [#allocation6]  }
  0x26   :  { %267 = dma.done.wait [#allocation3], 512  }
  0x27   :  { %268 = vsyncadd [#allocation3], 4294966784 }
  0x28   :  { %269 = dma.done.wait [#allocation6], 128  }
  0x29   :  { %270 = vsyncadd [#allocation6], 4294967168  ;;  %v277_v0 = vmov 0   ;;  %v41_v1 = vld [vmem:[%s351_s0] sm:$0xff]  ;;  %v57_v2 = vld [vmem:[#allocation2] sm:$0xff]  ;;  %v43_v9 = vlaneseq  ;;  %vm62_vm0 = vcmask 261120  }
  0x2a   :  { %200 = vset.pattern.permute.xlu0 %v277_v0  ;;  %v58_v3 = vld [vmem:[#allocation2 + $0x8] sm:$0xff]  ;;  %v59_v4 = vld [vmem:[#allocation2 + $0x10] sm:$0xff]  ;;  %v60_v5 = vld [vmem:[#allocation2 + $0x18] sm:$0xff]  ;;  %v278_v12 = vmov 0.0  }
  0x2b   :  { %46 = vperm.xlu0 %200, %v41_v1   ;;  %v42_v6 = vld [vmem:[%s351_s0 + $0x8] sm:$0xff]  ;;  %v185_v7 = vpack.c.bf16 %v58_v3, %v57_v2  ;;  %v189_v8 = vpack.c.bf16 %v60_v5, %v59_v4  ;;  %v44_v10 = vand.u32 127, %v43_v9  ;;  %v61_v16 = vld [vmem:[#allocation5] sm:$0xff]  ;;  %s279_s0 = smov [#allocation7]  }
  0x2c   :  { %s151_s2 = sshll.u32 %s279_s0, 4  ;;  %s152_s2 = int_to_ptr.vmem [resolvable:$true] %s151_s2 }
  0x2d   :  { %186 = vmatprep.subr.bf16.mxu0 %v185_v7  ;;  %s245_s17 = scalar_lea.vmem %s152_s2, 256  ;;  %p250_p5 = scmp.lt.s32.totalorder %s152_s2, %s152_s2 }
  0x2e   :  { %188 = vmatpush3.bf16.msra.mxu0 %v185_v7  ;;  %p246_p4 = scmp.ne.s32.totalorder %s152_s2, %s245_s17  ;;  %p251_p6 = scmp.lt.s32.totalorder %s245_s17, %s245_s17 }
  0x2f   :  { %49 = vperm.xlu0 %200, %v42_v6   ;;  %190 = vmatprep.subr.bf16.mxu0 %v189_v8 }
  0x30   :  { %p252_p7 = por %p251_p6, %p250_p5 }
  0x32   :  { %192 = vmatpush3.bf16.msra.mxu0 %v189_v8  ;;  %p253_p8 = pnand %p252_p7, %p246_p4 }
  0xaa   :  { %v47_v11 = vpop.permute.xlu0 %46 }
  0xab   :  { %vm51_vm1 = vcmp.eq.s32.totalorder %v44_v10, %v47_v11 }
  0xac   :  { %v164_v13 = vsel %vm51_vm1, 1.0, %v278_v12 }
  0xad   :  { %182 = vmatprep.mubr.msk.f32.mxu0 %vm62_vm0, %v164_v13 }
  0xae   :  { %v50_v14 = vpop.permute.xlu0 %49 }
  0xaf   :  { %vm52_vm2 = vcmp.eq.s32.totalorder %v44_v10, %v50_v14 }
  0xb0   :  { %v165_v15 = vsel %vm52_vm2, 1.0, %v278_v12 }
  0xb1   :  { %183 = vmatmul.mubr.msk.f32.vlgmr.msra.gmra.mrb[0].mxu0 %vm62_vm0, %v165_v15 }
 0x184   :  { %v184_v17 = vpop.f32.mrb[0].mxu0 }
 0x185   :  { %v141_v18 = vadd.f32 %v184_v17, %v61_v16  ;;  %v135_v19 = vpop.f32.mrb[1].mxu0 }
 0x186   :  { %v136_v20 = vadd.f32 %v135_v19, %v61_v16 }
 0x187   :  { %145 = vst [vmem:[#allocation7 + $0x8] sm:$0xff] %v141_v18 }
 0x188   :  { %144 = vst [vmem:[#allocation7] sm:$0xff] %v136_v20 }
 0x189   :  { %256 = shalt.err (!%p253_p8)
}
 0x18a   :  { %s257_s20 = scalar_lea.hbm %s354_s3, 256 }
 0x18b   :  { %p258_p9 = scmp.ne.s32.totalorder %s354_s3, %s257_s20  ;;  %p261_p10 = scmp.lt.u32.totalorder %s257_s20, %s354_s3 }
 0x18d   :  { %p263_p11 = pnand %p261_p10, %p258_p9 }
 0x18f   :  { %266 = shalt.err (!%p263_p11)
}
 0x190   :  { %157 = dma.vmem_to_hbm [thread:$0]  %s152_s2, 256, %s354_s3, [#allocation4], %s274_s22, %s274_s22, %s275_s23  }
 0x191   :  { %271 = dma.done.wait [#allocation4], 256  }
 0x192   :  { %272 = vsyncadd [#allocation4], 4294967040 }
 0x193   :  { %161 = vsyncpa [#allocation3], 1 }
 0x194   :  { %162 = vsyncpa [#allocation6], 1 }
 0x195   :  { %163 = vsyncpa [#allocation4], 1 }

</bundles_post_ra>
